<compile_context>
chip_gen: v5e
topology: v5e:2x2
jax: 0.10.0
libtpu: 0.0.40
codegen_flags: <defaults>
</compile_context>

<pallas_src>
import jax
import jax.numpy as jnp
import numpy as np
from jax import lax
from jax.experimental import pallas as pl
from jax.experimental.pallas import tpu as pltpu

# ---------------------------------------------------------------------------
# Synthetic, deterministic vocabulary layout (stands in for VocabularyConfig):
#   token 0           : START
#   token 1           : END
#   tokens 2..3       : reserved / unused
#   tokens   4..131   : NOTE_ON   pitch 0..127   (note_on_tokens[p]   = 4   + p)
#   tokens 132..259   : NOTE_OFF  pitch 0..127   (note_off_tokens[p]  = 132 + p)
#   tokens 260..387   : TIME_SHIFT (128 values)  (time_shift_tokens[i]= 260 + i)
#   tokens 388..515   : VELOCITY_CHANGE (128)    (velocity_tokens[i]  = 388 + i)
#   tokens 516..773   : other / unused
# ---------------------------------------------------------------------------
VOCAB_SIZE    = 774
START_TOKEN   = 0
END_TOKEN     = 1
NOTE_ON_BASE  = 4
NOTE_OFF_BASE = 132
TS_BASE       = 260
VEL_BASE      = 388
N_PITCH       = 128
N_TS          = 128
N_VEL         = 128
CONTEXT_LEN   = 5          # forward uses input_ids[b, max(0, s-5): s+1]

HOT  = 10.0
COLD = -10.0
BIG  = 1 << 20             # sentinel for "no NOTE_ON found" in the min-encode


# ---------------------------------------------------------------------------
# Pallas kernel: one grid step per (batch-tile, sequence-tile).  Fully
# vectorized: the rule cascade is evaluated on (TB, TS, *) int32 tiles and
# expanded to a (TB, TS, VOCAB) one-hot logits block with a single store.
# ---------------------------------------------------------------------------
def mock_music_kernel(ctx_ref, out_ref):
    # ctx_ref : VMEM (TB, TS, 1 + CONTEXT_LEN) int32
    #           channel 0 -> token at position s
    #           channel d -> token at position s - d (or -1 if out of range)
    # out_ref : VMEM (TB, TS, VOCAB) float32
    TB, TS, V = out_ref.shape
    C = ctx_ref.shape[-1]

    ctx = ctx_ref[...]                          # (TB, TS, C)
    last = ctx[:, :, 0:1]                       # (TB, TS, 1)

    # Rule flags for the most recent token (priority: START > VEL > NOTE_ON >
    # TIME_SHIFT > END), matching the reference elif chain.
    is_start = last == START_TOKEN
    is_vel   = (last >= VEL_BASE) & (last < VEL_BASE + N_VEL)
    is_non   = (last >= NOTE_ON_BASE) & (last < NOTE_ON_BASE + N_PITCH)
    is_ts    = (last >= TS_BASE) & (last < TS_BASE + N_TS)

    # TIME_SHIFT rule: most recent NOTE_ON among the up-to-5 previous tokens.
    # Channel-vectorized: encode (distance, pitch) per channel in one pass over
    # the full (TB, TS, C) block, then reduce with a tiny unrolled min-tree
    # over the previous-token channels (channel 0 = current token is excluded
    # simply by not entering the tree).
    d_iota = lax.broadcasted_iota(jnp.int32, (1, 1, C), 2)        # channel index d
    tok_is_non = (ctx >= NOTE_ON_BASE) & (ctx < NOTE_ON_BASE + N_PITCH)
    enc = jnp.where(tok_is_non,
                    ctx + (d_iota * 256 - NOTE_ON_BASE),          # d*256 + pitch
                    jnp.int32(BIG))
    best = enc[:, :, 1:2]                                         # d = 1 (most recent)
    for d in range(2, C):                                         # unrolled, C-2 mins
        best = jnp.minimum(best, enc[:, :, d:d + 1])
    found = best < BIG
    pitch = jnp.bitwise_and(best, 255)                            # low 8 bits = pitch

    # No NOTE_ON in the previous context -> last_pitch defaults to 60, next
    # pitch 62 (context length <= 6, so the "len(context) > 20" branch of the
    # reference module is unreachable).
    hot_ts = jnp.where(found,
                       jnp.int32(NOTE_OFF_BASE) + pitch,
                       jnp.int32(NOTE_ON_BASE + 62))

    hot = jnp.where(is_start, jnp.int32(VEL_BASE + 16),
          jnp.where(is_vel,   jnp.int32(NOTE_ON_BASE + 60),
          jnp.where(is_non,   jnp.int32(TS_BASE + 32),
          jnp.where(is_ts,    hot_ts, jnp.int32(END_TOKEN)))))

    # Position s == 0 always uses context = [START_TOKEN].  Gate on the GLOBAL
    # sequence position (first S-tile only).
    seq_off = pl.program_id(1) * TS
    s_iota = lax.broadcasted_iota(jnp.int32, (1, TS, 1), 1) + seq_off
    hot = jnp.where(s_iota == 0, jnp.int32(VEL_BASE + 16), hot)

    # One-hot expansion: exactly one i32 compare + one f32 select per output
    # vreg (vocab iota hoisted, no extra arithmetic), single vectorized store.
    vocab_iota = lax.broadcasted_iota(jnp.int32, (1, 1, V), 2)
    out_ref[...] = jnp.where(vocab_iota == hot,
                             jnp.float32(HOT), jnp.float32(COLD))


# ---------------------------------------------------------------------------
# Tiling / wrapper
# ---------------------------------------------------------------------------
def _round_up(x, m):
    return ((x + m - 1) // m) * m


def _pick_tiles(B, S, vocab, target_bytes=4 << 20):
    """Pick (TB, TS): output blocks ~1-4 MiB, >=2 (ideally >=4) grid steps."""
    row_bytes = vocab * 4
    max_rows = max(8, target_bytes // row_bytes)

    # Largest divisor of S that is a multiple of 8 and fits the byte target;
    # otherwise take the whole sequence (small / oddly shaped S).
    ts = S
    start = (min(S, max_rows) // 8) * 8
    for cand in range(start, 7, -8):
        if S % cand == 0:
            ts = cand
            break

    # Largest divisor of B whose (TB, TS, V) block still fits the target.
    max_tb = max(1, target_bytes // (ts * row_bytes))
    tb = 1
    for cand in range(min(B, max_tb), 0, -1):
        if B % cand == 0:
            tb = cand
            break

    def n_steps():
        return (B // tb) * (S // ts)

    # Megacore (v7x has 2 TensorCores): make sure the parallel grid has >= 2
    # steps, and try for >= 4 as long as blocks stay >= ~1 MiB.
    while n_steps() < 4:
        if tb > 1:
            tb = next(c for c in range(tb - 1, 0, -1) if B % c == 0)
        elif (ts >= 16 and ts % 16 == 0
              and (n_steps() < 2 or (ts // 2) * row_bytes >= (1 << 20))):
            ts //= 2
        else:
            break
    return tb, ts


def _build_context(ids):
    """(B, S) int32 -> (B, S, 1+CONTEXT_LEN) int32 (layout plumbing only)."""
    B, S = ids.shape
    chans = [ids]
    for d in range(1, CONTEXT_LEN + 1):
        if d < S:
            shifted = jnp.concatenate(
                [jnp.full((B, d), -1, jnp.int32), ids[:, :S - d]], axis=1)
        else:
            shifted = jnp.full((B, S), -1, jnp.int32)
        chans.append(shifted)
    return jnp.stack(chans, axis=-1)


def mock_music_model(input_ids):
    """input_ids: (B, S) int -> logits (B, S, VOCAB_SIZE) float32."""
    input_ids = input_ids.astype(jnp.int32)
    B, S = input_ids.shape
    ctx = _build_context(input_ids)            # (B, S, 1+CONTEXT_LEN)
    C = ctx.shape[-1]
    TB, TS = _pick_tiles(B, S, VOCAB_SIZE)

    # Explicit scoped-VMEM budget: 2x double-buffered (output + context) blocks
    # plus margin, clamped to stay under v7x's 64 MiB physical VMEM.
    out_blk = TB * _round_up(TS, 8) * _round_up(VOCAB_SIZE, 128) * 4
    ctx_blk = TB * _round_up(TS, 8) * 128 * 4          # C padded to 128 lanes
    vmem_limit = int(min(max(2 * (out_blk + ctx_blk) + (4 << 20), 32 << 20),
                         64 << 20))

    cost = pl.CostEstimate(
        flops=B * S * VOCAB_SIZE,              # ~1 compare+select per logit
        transcendentals=0,
        bytes_accessed=B * S * VOCAB_SIZE * 4 + B * S * C * 4)

    return pl.pallas_call(
        mock_music_kernel,
        out_shape=jax.ShapeDtypeStruct((B, S, VOCAB_SIZE), jnp.float32),
        grid_spec=pltpu.PrefetchScalarGridSpec(
            num_scalar_prefetch=0,
            grid=(B // TB, S // TS),
            in_specs=[pl.BlockSpec((TB, TS, C), lambda i, j: (i, j, 0))],
            out_specs=pl.BlockSpec((TB, TS, VOCAB_SIZE), lambda i, j: (i, j, 0)),
        ),
        compiler_params=pltpu.CompilerParams(
            dimension_semantics=("parallel", "parallel"),
            vmem_limit_bytes=vmem_limit),
        cost_estimate=cost,
    )(ctx)


# ---------------------------------------------------------------------------
# Pure-Python reference mirroring the PyTorch module exactly (for validation).
# ---------------------------------------------------------------------------
_NOTE_ON  = {p: NOTE_ON_BASE + p for p in range(N_PITCH)}
_NOTE_OFF = {p: NOTE_OFF_BASE + p for p in range(N_PITCH)}
_TS_TOKS  = [TS_BASE + i for i in range(N_TS)]
_VEL_TOKS = [VEL_BASE + i for i in range(N_VEL)]


def _ref_next_token_probs(context):
    logits = np.full((VOCAB_SIZE,), COLD, dtype=np.float32)
    last_token = context[-1]
    if last_token == START_TOKEN:
        if len(_VEL_TOKS) > 16:
            logits[_VEL_TOKS[16]] = HOT
    elif last_token in _VEL_TOKS:
        if 60 in _NOTE_ON:
            logits[_NOTE_ON[60]] = HOT
    elif any(last_token == _NOTE_ON.get(p, -1) for p in range(128)):
        if len(_TS_TOKS) > 32:
            logits[_TS_TOKS[32]] = HOT
    elif last_token in _TS_TOKS:
        for i in range(len(context) - 2, -1, -1):
            token = context[i]
            for pitch, non_tok in _NOTE_ON.items():
                if token == non_tok:
                    if pitch in _NOTE_OFF:
                        logits[_NOTE_OFF[pitch]] = HOT
                        return logits
        if len(context) > 20:
            logits[END_TOKEN] = HOT
        else:
            last_pitch = 60
            for i in range(len(context) - 1, -1, -1):
                for pitch, tok in _NOTE_ON.items():
                    if context[i] == tok:
                        last_pitch = pitch
                        break
            next_pitch = last_pitch + 2
            if next_pitch <= 72 and next_pitch in _NOTE_ON:
                logits[_NOTE_ON[next_pitch]] = HOT
            else:
                logits[END_TOKEN] = HOT
    else:
        logits[END_TOKEN] = HOT
    return logits


def reference_forward(input_ids_np):
    B, S = input_ids_np.shape
    logits = np.zeros((B, S, VOCAB_SIZE), dtype=np.float32)
    for b in range(B):
        for s in range(S):
            if s == 0:
                context = [START_TOKEN]
            else:
                context = [int(t) for t in input_ids_np[b, max(0, s - 5):s + 1]]
            logits[b, s] = _ref_next_token_probs(context)
    return logits


# ---------------------------------------------------------------------------
if __name__ == "__main__":
    B, S = 2, 8
    key = jax.random.PRNGKey(0)
    # A mix of tokens so several rules are exercised: random draw over the
    # full vocabulary range.
    input_ids = jax.random.randint(key, (B, S), 0, VOCAB_SIZE, dtype=jnp.int32)

    out = mock_music_model(input_ids)
    out = jax.block_until_ready(out)

    ref = reference_forward(np.asarray(input_ids))
    np.testing.assert_allclose(np.asarray(out), ref, rtol=0, atol=0)

    print("KERNEL_OK")
</pallas_src>

<mosaic_0001>
module attributes {stable_mosaic.version = 11 : i64} {
  func.func @mock_music_kernel(%arg0: i32, %arg1: i32, %arg2: memref<1x8x6xi32, #tpu.memory_space<vmem>>, %arg3: memref<1x8x774xf32, #tpu.memory_space<vmem>>) attributes {dimension_semantics = [#tpu.dimension_semantics<parallel>, #tpu.dimension_semantics<parallel>], iteration_bounds = array<i64: 2, 1>, scalar_prefetch = 0 : i64, scratch_operands = 0 : i64, tpu.core_type = #tpu.core_type<tc>, window_params = [{transform_indices = @transform_0, window_bounds = array<i64: 1, 8, 6>}, {transform_indices = @transform_1, window_bounds = array<i64: 1, 8, 774>}]} {
    %c0 = arith.constant 0 : index
    %c0_0 = arith.constant 0 : index
    %c0_1 = arith.constant 0 : index
    %0 = vector.load %arg2[%c0, %c0_0, %c0_1] : memref<1x8x6xi32, #tpu.memory_space<vmem>>, vector<1x8x6xi32>
    %1 = vector.extract_strided_slice %0 {offsets = [0, 0, 0], sizes = [1, 8, 1], strides = [1, 1, 1]} : vector<1x8x6xi32> to vector<1x8x1xi32>
    %c0_i32 = arith.constant 0 : i32
    %2 = vector.broadcast %c0_i32 : i32 to vector<1x8x1xi32>
    %3 = arith.cmpi eq, %1, %2 : vector<1x8x1xi32>
    %c388_i32 = arith.constant 388 : i32
    %4 = vector.broadcast %c388_i32 : i32 to vector<1x8x1xi32>
    %5 = arith.cmpi sge, %1, %4 : vector<1x8x1xi32>
    %c516_i32 = arith.constant 516 : i32
    %6 = vector.broadcast %c516_i32 : i32 to vector<1x8x1xi32>
    %7 = arith.cmpi slt, %1, %6 : vector<1x8x1xi32>
    %8 = arith.andi %5, %7 : vector<1x8x1xi1>
    %c4_i32 = arith.constant 4 : i32
    %9 = vector.broadcast %c4_i32 : i32 to vector<1x8x1xi32>
    %10 = arith.cmpi sge, %1, %9 : vector<1x8x1xi32>
    %c132_i32 = arith.constant 132 : i32
    %11 = vector.broadcast %c132_i32 : i32 to vector<1x8x1xi32>
    %12 = arith.cmpi slt, %1, %11 : vector<1x8x1xi32>
    %13 = arith.andi %10, %12 : vector<1x8x1xi1>
    %c260_i32 = arith.constant 260 : i32
    %14 = vector.broadcast %c260_i32 : i32 to vector<1x8x1xi32>
    %15 = arith.cmpi sge, %1, %14 : vector<1x8x1xi32>
    %c388_i32_2 = arith.constant 388 : i32
    %16 = vector.broadcast %c388_i32_2 : i32 to vector<1x8x1xi32>
    %17 = arith.cmpi slt, %1, %16 : vector<1x8x1xi32>
    %18 = arith.andi %15, %17 : vector<1x8x1xi1>
    %19 = tpu.iota {dimensions = array<i32: 2>} : vector<1x1x6xi32>
    %c4_i32_3 = arith.constant 4 : i32
    %20 = vector.broadcast %c4_i32_3 : i32 to vector<1x8x6xi32>
    %21 = arith.cmpi sge, %0, %20 : vector<1x8x6xi32>
    %c132_i32_4 = arith.constant 132 : i32
    %22 = vector.broadcast %c132_i32_4 : i32 to vector<1x8x6xi32>
    %23 = arith.cmpi slt, %0, %22 : vector<1x8x6xi32>
    %24 = arith.andi %21, %23 : vector<1x8x6xi1>
    %c256_i32 = arith.constant 256 : i32
    %25 = vector.broadcast %c256_i32 : i32 to vector<1x1x6xi32>
    %26 = arith.muli %19, %25 : vector<1x1x6xi32>
    %c4_i32_5 = arith.constant 4 : i32
    %27 = vector.broadcast %c4_i32_5 : i32 to vector<1x1x6xi32>
    %28 = arith.subi %26, %27 : vector<1x1x6xi32>
    %29 = vector.broadcast %28 : vector<1x1x6xi32> to vector<1x8x6xi32>
    %30 = arith.addi %0, %29 : vector<1x8x6xi32>
    %c1048576_i32 = arith.constant 1048576 : i32
    %31 = vector.broadcast %c1048576_i32 : i32 to vector<1x8x6xi32>
    %32 = arith.select %24, %30, %31 : vector<1x8x6xi1>, vector<1x8x6xi32>
    %33 = vector.extract_strided_slice %32 {offsets = [0, 0, 1], sizes = [1, 8, 1], strides = [1, 1, 1]} : vector<1x8x6xi32> to vector<1x8x1xi32>
    %34 = vector.extract_strided_slice %32 {offsets = [0, 0, 2], sizes = [1, 8, 1], strides = [1, 1, 1]} : vector<1x8x6xi32> to vector<1x8x1xi32>
    %35 = arith.minsi %33, %34 : vector<1x8x1xi32>
    %36 = vector.extract_strided_slice %32 {offsets = [0, 0, 3], sizes = [1, 8, 1], strides = [1, 1, 1]} : vector<1x8x6xi32> to vector<1x8x1xi32>
    %37 = arith.minsi %35, %36 : vector<1x8x1xi32>
    %38 = vector.extract_strided_slice %32 {offsets = [0, 0, 4], sizes = [1, 8, 1], strides = [1, 1, 1]} : vector<1x8x6xi32> to vector<1x8x1xi32>
    %39 = arith.minsi %37, %38 : vector<1x8x1xi32>
    %40 = vector.extract_strided_slice %32 {offsets = [0, 0, 5], sizes = [1, 8, 1], strides = [1, 1, 1]} : vector<1x8x6xi32> to vector<1x8x1xi32>
    %41 = arith.minsi %39, %40 : vector<1x8x1xi32>
    %c1048576_i32_6 = arith.constant 1048576 : i32
    %42 = vector.broadcast %c1048576_i32_6 : i32 to vector<1x8x1xi32>
    %43 = arith.cmpi slt, %41, %42 : vector<1x8x1xi32>
    %c255_i32 = arith.constant 255 : i32
    %44 = vector.broadcast %c255_i32 : i32 to vector<1x8x1xi32>
    %45 = arith.andi %41, %44 : vector<1x8x1xi32>
    %c132_i32_7 = arith.constant 132 : i32
    %46 = vector.broadcast %c132_i32_7 : i32 to vector<1x8x1xi32>
    %47 = arith.addi %46, %45 : vector<1x8x1xi32>
    %c66_i32 = arith.constant 66 : i32
    %48 = vector.broadcast %c66_i32 : i32 to vector<1x8x1xi32>
    %49 = arith.select %43, %47, %48 : vector<1x8x1xi1>, vector<1x8x1xi32>
    %c1_i32 = arith.constant 1 : i32
    %50 = vector.broadcast %c1_i32 : i32 to vector<1x8x1xi32>
    %51 = arith.select %18, %49, %50 : vector<1x8x1xi1>, vector<1x8x1xi32>
    %c292_i32 = arith.constant 292 : i32
    %52 = vector.broadcast %c292_i32 : i32 to vector<1x8x1xi32>
    %53 = arith.select %13, %52, %51 : vector<1x8x1xi1>, vector<1x8x1xi32>
    %c64_i32 = arith.constant 64 : i32
    %54 = vector.broadcast %c64_i32 : i32 to vector<1x8x1xi32>
    %55 = arith.select %8, %54, %53 : vector<1x8x1xi1>, vector<1x8x1xi32>
    %c404_i32 = arith.constant 404 : i32
    %56 = vector.broadcast %c404_i32 : i32 to vector<1x8x1xi32>
    %57 = arith.select %3, %56, %55 : vector<1x8x1xi1>, vector<1x8x1xi32>
    %c8_i32 = arith.constant 8 : i32
    %58 = arith.muli %arg1, %c8_i32 : i32
    %59 = tpu.iota {dimensions = array<i32: 1>} : vector<1x8x1xi32>
    %60 = vector.broadcast %58 : i32 to vector<1x8x1xi32>
    %61 = arith.addi %59, %60 : vector<1x8x1xi32>
    %c0_i32_8 = arith.constant 0 : i32
    %62 = vector.broadcast %c0_i32_8 : i32 to vector<1x8x1xi32>
    %63 = arith.cmpi eq, %61, %62 : vector<1x8x1xi32>
    %c404_i32_9 = arith.constant 404 : i32
    %64 = vector.broadcast %c404_i32_9 : i32 to vector<1x8x1xi32>
    %65 = arith.select %63, %64, %57 : vector<1x8x1xi1>, vector<1x8x1xi32>
    %66 = tpu.iota {dimensions = array<i32: 2>} : vector<1x1x774xi32>
    %67 = vector.broadcast %66 : vector<1x1x774xi32> to vector<1x8x774xi32>
    %68 = vector.broadcast %65 : vector<1x8x1xi32> to vector<1x8x774xi32>
    %69 = arith.cmpi eq, %67, %68 : vector<1x8x774xi32>
    %cst = arith.constant 1.000000e+01 : f32
    %cst_10 = arith.constant -1.000000e+01 : f32
    %70 = vector.broadcast %cst : f32 to vector<1x8x774xf32>
    %71 = vector.broadcast %cst_10 : f32 to vector<1x8x774xf32>
    %72 = arith.select %69, %70, %71 : vector<1x8x774xi1>, vector<1x8x774xf32>
    %c0_11 = arith.constant 0 : index
    %c0_12 = arith.constant 0 : index
    %c0_13 = arith.constant 0 : index
    %73 = vector.load %arg3[%c0_11, %c0_12, %c0_13] : memref<1x8x774xf32, #tpu.memory_space<vmem>>, vector<1x8x774xf32>
    tpu.vector_store %arg3[%c0_11, %c0_12, %c0_13], %72 {strides = array<i32>} : memref<1x8x774xf32, #tpu.memory_space<vmem>>, vector<1x8x774xf32>,
    return
  }
  func.func @transform_0(%arg0: i32, %arg1: i32) -> (i32, i32, i32) {
    %c0_i32 = arith.constant 0 : i32
    %c0_i32_0 = arith.constant 0 : i32
    return %arg0, %arg1, %c0_i32 : i32, i32, i32
  }
  func.func @transform_1(%arg0: i32, %arg1: i32) -> (i32, i32, i32) {
    %c0_i32 = arith.constant 0 : i32
    %c0_i32_0 = arith.constant 0 : i32
    return %arg0, %arg1, %c0_i32 : i32, i32, i32
  }
}

</mosaic_0001>

<bundles_post_ra>
// kernel: tpu_custom_call.1
= control target key start
LH: loop header
LB: loop body
LE: loop exit
PB: predicated region body
PF: predicated region fallthrough
CT: control target
= control target key end

     0   :  { %6 = vsyncpa [#allocation3], 0  ;;  %s600_s0 = inlined_call_operand.vmem [shape: s32[2,8,6], index: 0, kind: input, shape index: {}]   ;;  %s601_s1 = inlined_call_operand.hbm [shape: f32[2,8,774], index: 1, kind: output, shape index: {}]  }
   0x1   :  { %8 = vsyncpa [#allocation3 + $0x1], 0  ;;  %s481_s6 = smov 0   ;;  %s483_s7 = smov 0  }
   0x2   :  { %s485_s8 = smov 0   ;;  %s487_s9 = smov 0  }
   0x3   :  { %s489_s10 = smov 0   ;;  %s491_s11 = smov 0  }
   0x4 LB: > { %s310_s12 = sadd.s32 4294967295, %s463_s11   ;;  %s311_s13 = sadd.s32 4294967294, %s463_s11   ;;  %s463_s11 = sphi %s491_s11, %s14_s11   ;;  %s459_s10 = sphi %s489_s10, %s610_s10   ;;  %s455_s9 = sphi %s487_s9, %s609_s9   ;;  %s451_s8 = sphi %s485_s8, %s608_s8   ;;  %s447_s7 = sphi %s483_s7, %s607_s7   ;;  %s443_s6 = sphi %s481_s6, %s606_s6  }
   0x5   : > { %s26_s14 = sadd.s32 1, %s459_s10  ;;  %s63_s15 = sadd.s32 1, %s451_s8 }
   0x6   : > { %p28_p0 = scmp.ge.s32.totalorder %s26_s14, 2  ;;  %p73_p1 = scmp.ne.s32.totalorder %s451_s8, %s447_s7 }
   0x7   : > { %p74_p2 = scmp.eq.s32.totalorder %s310_s12, 1  ;;  %p79_p3 = scmp.ne.s32.totalorder %s447_s7, %s443_s6 }
   0x8   : > { %s612_s14 = smov (%p28_p0, %s26_s14), 0  ;;  %p80_p5 = scmp.eq.s32.totalorder %s311_s13, 1 }
   0x9   : > { %p521_p4 = por %p74_p2, %p73_p1  ;;  %s58_s17 = ssub.s32 %s459_s10, %s612_s14 }
   0xa   : > { %p314_p6 = scmp.ge.s32.totalorder %s463_s11, 1  ;;  %p61_p7 = scmp.eq.s32.totalorder %s58_s17, 0 }
   0xb   : > { %p528_p8 = por %p80_p5, %p79_p3  ;;  %p108_p9 = scmp.lt.s32.totalorder %s463_s11, 3 }
   0xc   : > { %s534_s19 = scalar_select %p61_p7, %s451_s8, %s63_s15  }
   0xd   : > { %p109_p10 = pnand %p314_p6, %p108_p9 }
   0xe   : > { %p130_p11 = scmp.lt.s32.totalorder (!%p109_p10), %s455_s9, 1  ;;  %s465_s25 = smov (!%p109_p10), 127  }
   0xf   : > { %112 = sbr.rel (%p109_p10) target bundleno = 363 (0x16b), region = 24  ;;  %s466_s26 = smov (!%p109_p10), 125  }
  0x10   : > { %s467_s27 = smov (!%p109_p10), 126   ;;  %s468_s28 = smov (!%p109_p10), 124  }
  0x11   : > { %s127_s29 = sand.u32 (!%p109_p10), 1, %s447_s7   ;;  %s321_s2 = smul.u32 (!%p109_p10), 56, %s455_s9 }
  0x12   : > { %s320_s30 = smul.u32 (!%p109_p10), 56, %s127_s29  ;;  %s219_s15 = scalar_lea.sflag (!%p109_p10), [#allocation3], %s127_s29 }
  0x13   : > { %s232_s5 = scalar_lea.hbm (!%p109_p10), %s601_s1, %s321_s2  ;;  %s405_s23 = scalar_lea.hbm (!%p109_p10), %s601_s1, 112 }
  0x14   : > { %v148_v0 = vlaneseq  ;;  %s131_s20 = scalar_select %p130_p11, %s455_s9, 1  ;;  %v469_v19 = vmov 0   ;;  %v470_v34 = vmov -10.0  }
  0x15   : > { %383 = vset.pattern.permute.xlu2 %v469_v19  ;;  %384 = vset.pattern.permute.xlu0 %v469_v19  ;;  %s129_s9 = scalar_lea.vmem [#allocation2], %s320_s30  ;;  %s236_s13 = sshll.u32 %s232_s5, 4  ;;  %s237_s13 = int_to_ptr.hbm [resolvable:$true] %s236_s13 }
  0x16   : > { %v538_v1 = vand.u32 127, %v148_v0  ;;  %s315_s21 = sshll.u32 %s131_s20, 3  ;;  %v182_v20 = vshrl.u32 %v148_v0, 7  ;;  %s234_s12 = sshll.u32 %s129_s9, 4  ;;  %s235_s12 = int_to_ptr.vmem [resolvable:$true] %s234_s12 }
  0x17   : > { %s136_s24 = scalar_lea.vmem %s600_s0, %s315_s21  ;;  %s399_s17 = sshra.s32 %s237_s13, 4  ;;  %s400_s17 = int_to_ptr.hbm [resolvable:$true] %s399_s17 }
  0x18   : > { %v150_v2 = vmul.u32 256, %v538_v1  ;;  %v137_v3 = vld [vmem:[%s136_s24] sm:$0xff]  ;;  %vm185_vm15 = vcmp.eq.s32.totalorder %v182_v20, 0  ;;  %v187_v27 = vadd.s32 128, %v538_v1  ;;  %v188_v28 = vadd.s32 256, %v538_v1  ;;  %s401_s20 = scalar_lea.hbm %s400_s17, 56  ;;  %p406_p1 = scmp.lt.s32.totalorder %s400_s17, %s601_s1 }
  0x19   : > { %vm142_vm0 = vcmp.ge.s32.totalorder %v137_v3, 4  ;;  %vm143_vm1 = vcmp.lt.s32.totalorder %v137_v3, 132  ;;  %vm145_vm8 = vcmp.ge.s32.totalorder %v137_v3, 260  ;;  %vm146_vm9 = vcmp.lt.s32.totalorder %v137_v3, 388  ;;  %p402_p12 = scmp.ne.s32.totalorder %s400_s17, %s401_s20  ;;  %p407_p2 = scmp.lt.s32.totalorder %s405_s23, %s401_s20 }
  0x1a   : > { %v316_v4 = vadd.s32 4294967292, %v150_v2  ;;  %vm544_vm2 = vmand %vm142_vm0, %vm143_vm1  ;;  %vm139_vm10 = vcmp.ge.s32.totalorder %v137_v3, 388  ;;  %vm140_vm11 = vcmp.lt.s32.totalorder %v137_v3, 516  ;;  %vm138_vm14 = vcmp.eq.s32.totalorder %v137_v3, 0 }
  0x1b   : > { %vm147_vm12 = vmand %vm145_vm8, %vm146_vm9  ;;  %v189_v29 = vadd.s32 384, %v538_v1  ;;  %v190_v30 = vadd.s32 512, %v538_v1  ;;  %v191_v31 = vadd.s32 640, %v538_v1  ;;  %v192_v32 = vadd.s32 768, %v538_v1  ;;  %p403_p13 = pnand %p402_p12, %p521_p4  ;;  %p408_p3 = por %p407_p2, %p406_p1 }
  0x1c   : > { %v152_v6 = vadd.s32 %v316_v4, %v137_v3  ;;  %vm141_vm13 = vmand %vm139_vm10, %vm140_vm11 }
  0x1d   : > { %p404_p0 = pneg %p403_p13 }
  0x1e   : > { %v153_v7 = vsel %vm544_vm2, %v152_v6, 1048576 }
  0x1f   : > { %154 = vrot.lane.b32.xlu0 %v153_v7, %s465_s25  ;;  %162 = vrot.lane.b32.xlu1 %v153_v7, %s466_s26  ;;  %p409_p5 = pnand %p408_p3, %p404_p0 }
  0x27   : > { %158 = vrot.lane.b32.xlu0 %v153_v7, %s467_s27  ;;  %166 = vrot.lane.b32.xlu1 %v153_v7, %s468_s28 }
  0x91   : > { %v155_v8 = vpop.permute.xlu0 %154  ;;  %v163_v9 = vpop.permute.xlu1 %162 }
  0x92   : > { %vm156_vm3 = vcmp.lt.s32.totalorder %v153_v7, %v155_v8 }
  0x93   : > { %v157_v10 = vsel %vm156_vm3, %v153_v7, %v155_v8 }
  0x99   : > { %v159_v11 = vpop.permute.xlu0 %158  ;;  %v167_v13 = vpop.permute.xlu1 %166 }
  0x9a   : > { %vm160_vm4 = vcmp.lt.s32.totalorder %v157_v10, %v159_v11 }
  0x9b   : > { %v161_v12 = vsel %vm160_vm4, %v157_v10, %v159_v11 }
  0x9c   : > { %vm164_vm5 = vcmp.lt.s32.totalorder %v161_v12, %v163_v9 }
  0x9d   : > { %v165_v14 = vsel %vm164_vm5, %v161_v12, %v163_v9 }
  0x9e   : > { %vm168_vm6 = vcmp.lt.s32.totalorder %v165_v14, %v167_v13 }
  0x9f   : > { %v169_v15 = vsel %vm168_vm6, %v165_v14, %v167_v13 }
  0xa0   : > { %v171_v16 = vand.u32 255, %v169_v15  ;;  %vm170_vm7 = vcmp.lt.s32.totalorder %v169_v15, 1048576 }
  0xa2   : > { %v172_v17 = vadd.s32 132, %v171_v16 }
  0xa4   : > { %v173_v18 = vsel %vm170_vm7, %v172_v17, 66  ;;  %vm216_vm7 = vcmask 48128  }
  0xa5   : > { %174 = vrot.lane.b32.xlu2 %v173_v18, %s465_s25 }
  0xff   : > { %v175_v21 = vpop.permute.xlu2 %174 }
 0x100   : > { %v176_v22 = vsel %vm147_vm12, %v175_v21, 1 }
 0x101   : > { %v177_v23 = vsel %vm544_vm2, 292, %v176_v22 }
 0x102   : > { %v178_v24 = vsel %vm141_vm13, 64, %v177_v23 }
 0x103   : > { %v179_v25 = vsel %vm138_vm14, 404, %v178_v24 }
 0x104   : > { %v186_v26 = vsel %vm185_vm15, 404, %v179_v25 }
 0x105   : > { %194 = vperm.xlu2 %383, %v186_v26  }
 0x15f   : > { %v195_v33 = vpop.permute.xlu2 %194 }
 0x160   : > { %vm196_vm0 = vcmp.eq.s32.totalorder %v538_v1, %v195_v33  ;;  %vm197_vm1 = vcmp.eq.s32.totalorder %v187_v27, %v195_v33  ;;  %vm198_vm2 = vcmp.eq.s32.totalorder %v188_v28, %v195_v33  ;;  %vm199_vm3 = vcmp.eq.s32.totalorder %v189_v29, %v195_v33 }
 0x161   : > { %vm200_vm4 = vcmp.eq.s32.totalorder %v190_v30, %v195_v33  ;;  %vm201_vm5 = vcmp.eq.s32.totalorder %v191_v31, %v195_v33  ;;  %v203_v35 = vsel %vm196_vm0, 10.0, %v470_v34  ;;  %vm202_vm6 = vcmp.eq.s32.totalorder %v192_v32, %v195_v33 }
 0x162   : > { %v204_v36 = vsel %vm197_vm1, 10.0, %v470_v34  ;;  %v205_v37 = vsel %vm198_vm2, 10.0, %v470_v34  ;;  %v206_v38 = vsel %vm199_vm3, 10.0, %v470_v34  ;;  %210 = vst [vmem:[%s129_s9] sm:$0xff] %v203_v35  ;;  %v207_v39 = vsel %vm200_vm4, 10.0, %v470_v34 }
 0x163   : > { %211 = vst [vmem:[%s129_s9 + $0x8] sm:$0xff] %v204_v36  ;;  %v208_v40 = vsel %vm201_vm5, 10.0, %v470_v34  ;;  %v209_v41 = vsel %vm202_vm6, 10.0, %v470_v34 }
 0x164   : > { %212 = vst [vmem:[%s129_s9 + $0x10] sm:$0xff] %v205_v37 }
 0x165   : > { %213 = vst [vmem:[%s129_s9 + $0x18] sm:$0xff] %v206_v38 }
 0x166   : > { %214 = vst [vmem:[%s129_s9 + $0x20] sm:$0xff] %v207_v39 }
 0x167   : > { %215 = vst [vmem:[%s129_s9 + $0x28] sm:$0xff] %v208_v40 }
 0x168   : > { %217 = vst.msk [vmem:[%s129_s9 + $0x30] sm:$0xff] %vm216_vm7, %v209_v41 }
 0x169   : > { %412 = shalt.err (!%p409_p5)
}
 0x16a   : > { %322 = dma.vmem_to_hbm [thread:$0]  (%p521_p4), %s235_s12, 896, %s237_s13, %s219_s15  }
 0x16b PF: > { %p328_p6 = scmp.ge.s32.totalorder %s463_s11, 2  ;;  %s248_s26 = sand.u32 1, %s443_s6  }
 0x16c   : > { %s249_s27 = scalar_lea.sflag [#allocation3], %s248_s26 }
 0x16d   : > { %p325_p7 = pnand %p328_p6, %p528_p8 }
 0x16f   : > { %p326_p9 = pneg %p325_p7 }
 0x171   : > { %438 = dma.done.wait (%p326_p9), %s249_s27, 896  }
 0x172   : > { %440 = vsyncadd (%p326_p9), %s249_s27, 4294966400  ;;  %s14_s11 = sadd.s32 1, %s463_s11   ;;  %s606_s6 = smov %s447_s7 }
 0x173   : > { %p11_p10 = scmp.ge.s32.totalorder %s14_s11, 4   ;;  %s607_s7 = smov %s451_s8 }
 0x174   : > { %s608_s8 = smov %s534_s19  ;;  %s609_s9 = smov %s459_s10 }
 0x175   : > { %s610_s10 = smov %s612_s14  ;;  %13 = sbr.rel (!%p11_p10) target bundleno = 4 (0x4), region = 59 }
 0x17a   :  { %255 = vsyncpa [#allocation3], 1 }
 0x17b   :  { %257 = vsyncpa [#allocation3 + $0x1], 1 }

</bundles_post_ra>
